<compile_context>
chip_gen: v7x
topology: tpu7x:2x2x1
jax: 0.10.0
libtpu: 0.0.40
codegen_flags: <defaults>
</compile_context>

<pallas_src>
import jax
import jax.numpy as jnp
from jax.experimental import pallas as pl
from jax.experimental.pallas import tpu as pltpu

LANES = 128             # TPU vreg lane width
SUBLANES = 8            # f32 sublanes per vreg
_SMEM_TABLE_MAX = 2048  # flat weight tables up to this size are gathered in-kernel


def _make_kinf_kernel(tile_r, n_elems, needs_mask):
    """Build the KInf kernel with trace-time constants baked in."""

    def _fold(contrib):
        # Sublane fold into (8, 128): pure vreg-vreg VALU adds (~1 add/elem),
        # no per-step XLU reduce and no per-step scalar store.
        return jnp.sum(
            contrib.reshape(tile_r // SUBLANES, SUBLANES, LANES), axis=0)

    def kernel(idx_ref, w_ref, ub_ref, p_ref, d_ref, out_ref, acc_ref):
        # idx_ref: (1,)           int32 SMEM  flat index into w_ref
        # w_ref:   (W,)           f32   SMEM  flattened weights (or pre-gathered scalar)
        # ub_ref:  (1,)           f32   SMEM  scalar upper_bound
        # p_ref:   (tile_r, 128)  f32   VMEM  block of p
        # d_ref:   (tile_r, 128)  f32   VMEM  block of delta
        # out_ref: (1, 1)         f32   VMEM  scalar result (same block every step)
        # acc_ref: (8, 128)       f32   VMEM  scratch accumulator
        i = pl.program_id(0)
        last = pl.num_programs(0) - 1

        @pl.when(i == 0)
        def _init():
            acc_ref[...] = jnp.zeros_like(acc_ref)

        ub = ub_ref[0]
        w_sa = w_ref[idx_ref[0]]      # scalar SMEM gather of weights[s, a]

        def _unmasked():
            arg = ub - d_ref[...] * w_sa
            acc_ref[...] += _fold(p_ref[...] * jnp.log(arg))

        if needs_mask:
            # Padding exists only in the final grid step; keep the steady-state
            # loop free of iota / compare / select work.
            def _masked():
                row = jax.lax.broadcasted_iota(jnp.int32, (tile_r, LANES), 0)
                lane = jax.lax.broadcasted_iota(jnp.int32, (tile_r, LANES), 1)
                gidx = (i * tile_r + row) * LANES + lane
                valid = gidx < n_elems
                arg = jnp.where(valid, ub - d_ref[...] * w_sa, 1.0)
                pv = jnp.where(valid, p_ref[...], 0.0)
                acc_ref[...] += _fold(pv * jnp.log(arg))

            @pl.when(i < last)
            def _hot():
                _unmasked()

            @pl.when(i == last)
            def _tail():
                _masked()
        else:
            _unmasked()

        @pl.when(i == last)
        def _finalize():
            # One-time cross-lane reduce (XLU), negate and (1, 1) store.
            out_ref[...] = -jnp.sum(acc_ref[...], keepdims=True)

    return kernel


def kinf_block_forward(weights, s, a, p, upper_bound, delta, *, max_tile_rows=2048):
    """Pallas equivalent of KInfBlock.forward: -sum(p * log(ub - delta * w[s, a]))."""
    weights = jnp.asarray(weights, jnp.float32)
    n_actions = weights.shape[-1]

    # Scalar gather weights[s, a]: fused in-kernel via SMEM indexing when the
    # table is small; otherwise a single-element gather here (still no slab).
    if weights.size <= _SMEM_TABLE_MAX:
        w_table = weights.reshape(-1)
        flat_idx = jnp.asarray(s, jnp.int32) * n_actions + jnp.asarray(a, jnp.int32)
    else:
        w_table = weights[jnp.asarray(s), jnp.asarray(a)].reshape(1)
        flat_idx = jnp.zeros((), jnp.int32)

    # Broadcast only the vector operands against each other (torch semantics).
    p_b, d_b = jnp.broadcast_arrays(
        jnp.asarray(p, jnp.float32), jnp.asarray(delta, jnp.float32))
    n_elems = int(p_b.size)   # trace-time constant

    rows_needed = max(1, pl.cdiv(n_elems, LANES))
    tile_r = min(int(max_tile_rows), pl.cdiv(rows_needed, SUBLANES) * SUBLANES)
    tile_r = max(SUBLANES, (tile_r // SUBLANES) * SUBLANES)   # multiple of 8
    grid_r = pl.cdiv(rows_needed, tile_r)
    total_rows = grid_r * tile_r
    padded = total_rows * LANES
    needs_mask = padded != n_elems

    def _pad2d(x):
        flat = x.reshape(-1)
        if flat.size != padded:
            flat = jnp.pad(flat, (0, padded - flat.size))
        return flat.reshape(total_rows, LANES)

    p2 = _pad2d(p_b)
    d2 = _pad2d(d_b)

    idx = flat_idx.reshape(1).astype(jnp.int32)
    ub = jnp.asarray(upper_bound, jnp.float32).reshape(1)

    kernel = _make_kinf_kernel(tile_r, n_elems, needs_mask)

    out = pl.pallas_call(
        kernel,
        out_shape=jax.ShapeDtypeStruct((1, 1), jnp.float32),
        grid_spec=pltpu.PrefetchScalarGridSpec(
            num_scalar_prefetch=0,
            grid=(grid_r,),
            in_specs=[
                pl.BlockSpec(memory_space=pltpu.MemorySpace.SMEM),  # flat (s, a) index
                pl.BlockSpec(memory_space=pltpu.MemorySpace.SMEM),  # weights (flat)
                pl.BlockSpec(memory_space=pltpu.MemorySpace.SMEM),  # upper_bound
                pl.BlockSpec((tile_r, LANES), lambda i: (i, 0)),    # p
                pl.BlockSpec((tile_r, LANES), lambda i: (i, 0)),    # delta
            ],
            out_specs=pl.BlockSpec((1, 1), lambda i: (0, 0)),
            scratch_shapes=[pltpu.VMEM((SUBLANES, LANES), jnp.float32)],
        ),
        compiler_params=pltpu.CompilerParams(
            dimension_semantics=("arbitrary",)),   # reduction axis (accumulator)
    )(idx, w_table, ub, p2, d2)
    return out[0, 0]


if __name__ == "__main__":
    key = jax.random.PRNGKey(0)
    nbr_states, nbr_actions = 16, 4
    k_w, k_p, k_d = jax.random.split(key, 3)

    # Module __init__ uses torch.zeros((S, A)); zeros make the forward trivial,
    # so initialize deterministically with small values to exercise the kernel.
    weights = 0.05 * jax.random.normal(k_w, (nbr_states, nbr_actions), jnp.float32)

    # Typical KInf call: one (state, action) pair, a probability vector p over
    # next states, a per-state delta vector and a scalar upper bound.
    s = jnp.int32(3)
    a = jnp.int32(1)
    p = jax.nn.softmax(jax.random.normal(k_p, (nbr_states,), jnp.float32))
    delta = jax.random.uniform(k_d, (nbr_states,), jnp.float32)
    upper_bound = jnp.float32(2.0)

    out = kinf_block_forward(weights, s, a, p, upper_bound, delta)
    jax.block_until_ready(out)

    ref = -jnp.sum(p * jnp.log(upper_bound - delta * weights[s, a]))
    assert jnp.allclose(out, ref, rtol=1e-5, atol=1e-5), (float(out), float(ref))

    # Also exercise the multi-step grid path (accumulator, unmasked hot steps,
    # masked tail step) with a larger problem and a small tile.
    n_big = 20000
    k_p2, k_d2 = jax.random.split(k_d, 2)
    p_big = jax.nn.softmax(jax.random.normal(k_p2, (n_big,), jnp.float32))
    delta_big = jax.random.uniform(k_d2, (n_big,), jnp.float32)
    out_big = kinf_block_forward(weights, s, a, p_big, upper_bound, delta_big,
                                 max_tile_rows=64)
    jax.block_until_ready(out_big)
    ref_big = -jnp.sum(p_big * jnp.log(upper_bound - delta_big * weights[s, a]))
    assert jnp.allclose(out_big, ref_big, rtol=1e-4, atol=1e-5), (
        float(out_big), float(ref_big))

    print("KERNEL_OK")
</pallas_src>

<mosaic_0001>
module attributes {stable_mosaic.version = 11 : i64} {
  func.func @kernel(%arg0: i32, %arg1: memref<1xi32, #tpu.memory_space<smem>>, %arg2: memref<64xf32, #tpu.memory_space<smem>>, %arg3: memref<1xf32, #tpu.memory_space<smem>>, %arg4: memref<8x128xf32, #tpu.memory_space<vmem>>, %arg5: memref<8x128xf32, #tpu.memory_space<vmem>>, %arg6: memref<1x1xf32, #tpu.memory_space<vmem>>, %arg7: memref<8x128xf32, #tpu.memory_space<vmem>>) attributes {dimension_semantics = [#tpu.dimension_semantics<arbitrary>], iteration_bounds = array<i64: 1>, scalar_prefetch = 0 : i64, scratch_operands = 1 : i64, tpu.core_type = #tpu.core_type<tc>, window_params = [{transform_indices = @transform_0, window_bounds = array<i64: 1>}, {transform_indices = @transform_1, window_bounds = array<i64: 64>}, {transform_indices = @transform_2, window_bounds = array<i64: 1>}, {transform_indices = @transform_3, window_bounds = array<i64: 8, 128>}, {transform_indices = @transform_4, window_bounds = array<i64: 8, 128>}, {pipeline_mode = #tpu.pipeline_mode<synchronous>, transform_indices = @transform_5, window_bounds = array<i64: 1, 1>}]} {
    %c0_i32 = arith.constant 0 : i32
    %0 = arith.cmpi eq, %arg0, %c0_i32 : i32
    %1 = arith.extui %0 : i1 to i32
    %c0_i32_0 = arith.constant 0 : i32
    %2 = arith.cmpi ne, %1, %c0_i32_0 : i32
    scf.if %2 {
      %cst = arith.constant 0.000000e+00 : f32
      %16 = vector.broadcast %cst : f32 to vector<8x128xf32>
      %c0_8 = arith.constant 0 : index
      %c0_9 = arith.constant 0 : index
      %17 = vector.load %arg7[%c0_8, %c0_9] : memref<8x128xf32, #tpu.memory_space<vmem>>, vector<8x128xf32>
      tpu.vector_store %arg7[%c0_8, %c0_9], %16 {strides = array<i32>} : memref<8x128xf32, #tpu.memory_space<vmem>>, vector<8x128xf32>,
    } else {
    }
    %c0 = arith.constant 0 : index
    %3 = memref.load %arg3[%c0] : memref<1xf32, #tpu.memory_space<smem>>
    %c0_1 = arith.constant 0 : index
    %4 = memref.load %arg1[%c0_1] : memref<1xi32, #tpu.memory_space<smem>>
    %5 = arith.index_cast %4 : i32 to index
    %6 = memref.load %arg2[%5] : memref<64xf32, #tpu.memory_space<smem>>
    %c0_i32_2 = arith.constant 0 : i32
    %7 = arith.cmpi slt, %arg0, %c0_i32_2 : i32
    %8 = arith.extui %7 : i1 to i32
    %c0_i32_3 = arith.constant 0 : i32
    %9 = arith.cmpi ne, %8, %c0_i32_3 : i32
    scf.if %9 {
      %c0_8 = arith.constant 0 : index
      %c0_9 = arith.constant 0 : index
      %16 = vector.load %arg5[%c0_8, %c0_9] : memref<8x128xf32, #tpu.memory_space<vmem>>, vector<8x128xf32>
      %17 = vector.broadcast %6 : f32 to vector<8x128xf32>
      %18 = arith.mulf %16, %17 : vector<8x128xf32>
      %19 = vector.broadcast %3 : f32 to vector<8x128xf32>
      %20 = arith.subf %19, %18 : vector<8x128xf32>
      %c0_10 = arith.constant 0 : index
      %c0_11 = arith.constant 0 : index
      %21 = vector.load %arg7[%c0_10, %c0_11] : memref<8x128xf32, #tpu.memory_space<vmem>>, vector<8x128xf32>
      %c0_12 = arith.constant 0 : index
      %c0_13 = arith.constant 0 : index
      %22 = vector.load %arg4[%c0_12, %c0_13] : memref<8x128xf32, #tpu.memory_space<vmem>>, vector<8x128xf32>
      %23 = math.log %20 : vector<8x128xf32>
      %24 = arith.mulf %22, %23 : vector<8x128xf32>
      %25 = vector.shape_cast %24 : vector<8x128xf32> to vector<1x8x128xf32>
      %cst = arith.constant dense<0.000000e+00> : vector<8x128xf32>
      %26 = vector.multi_reduction <add>, %25, %cst [0] : vector<1x8x128xf32> to vector<8x128xf32>
      %27 = arith.addf %21, %26 : vector<8x128xf32>
      %c0_14 = arith.constant 0 : index
      %c0_15 = arith.constant 0 : index
      %28 = vector.load %arg7[%c0_14, %c0_15] : memref<8x128xf32, #tpu.memory_space<vmem>>, vector<8x128xf32>
      tpu.vector_store %arg7[%c0_14, %c0_15], %27 {strides = array<i32>} : memref<8x128xf32, #tpu.memory_space<vmem>>, vector<8x128xf32>,
    } else {
    }
    %c0_i32_4 = arith.constant 0 : i32
    %10 = arith.cmpi eq, %arg0, %c0_i32_4 : i32
    %11 = arith.extui %10 : i1 to i32
    %c0_i32_5 = arith.constant 0 : i32
    %12 = arith.cmpi ne, %11, %c0_i32_5 : i32
    scf.if %12 {
      %16 = tpu.iota {dimensions = array<i32: 0>} : vector<8x128xi32>
      %17 = tpu.iota {dimensions = array<i32: 1>} : vector<8x128xi32>
      %c8_i32 = arith.constant 8 : i32
      %18 = arith.muli %arg0, %c8_i32 : i32
      %19 = vector.broadcast %18 : i32 to vector<8x128xi32>
      %20 = arith.addi %19, %16 : vector<8x128xi32>
      %c128_i32 = arith.constant 128 : i32
      %21 = vector.broadcast %c128_i32 : i32 to vector<8x128xi32>
      %22 = arith.muli %20, %21 : vector<8x128xi32>
      %23 = arith.addi %22, %17 : vector<8x128xi32>
      %c16_i32 = arith.constant 16 : i32
      %24 = vector.broadcast %c16_i32 : i32 to vector<8x128xi32>
      %25 = arith.cmpi slt, %23, %24 : vector<8x128xi32>
      %c0_8 = arith.constant 0 : index
      %c0_9 = arith.constant 0 : index
      %26 = vector.load %arg5[%c0_8, %c0_9] : memref<8x128xf32, #tpu.memory_space<vmem>>, vector<8x128xf32>
      %27 = vector.broadcast %6 : f32 to vector<8x128xf32>
      %28 = arith.mulf %26, %27 : vector<8x128xf32>
      %29 = vector.broadcast %3 : f32 to vector<8x128xf32>
      %30 = arith.subf %29, %28 : vector<8x128xf32>
      %cst = arith.constant 1.000000e+00 : f32
      %31 = vector.broadcast %cst : f32 to vector<8x128xf32>
      %32 = arith.select %25, %30, %31 : vector<8x128xi1>, vector<8x128xf32>
      %c0_10 = arith.constant 0 : index
      %c0_11 = arith.constant 0 : index
      %33 = vector.load %arg4[%c0_10, %c0_11] : memref<8x128xf32, #tpu.memory_space<vmem>>, vector<8x128xf32>
      %cst_12 = arith.constant 0.000000e+00 : f32
      %34 = vector.broadcast %cst_12 : f32 to vector<8x128xf32>
      %35 = arith.select %25, %33, %34 : vector<8x128xi1>, vector<8x128xf32>
      %c0_13 = arith.constant 0 : index
      %c0_14 = arith.constant 0 : index
      %36 = vector.load %arg7[%c0_13, %c0_14] : memref<8x128xf32, #tpu.memory_space<vmem>>, vector<8x128xf32>
      %37 = math.log %32 : vector<8x128xf32>
      %38 = arith.mulf %35, %37 : vector<8x128xf32>
      %39 = vector.shape_cast %38 : vector<8x128xf32> to vector<1x8x128xf32>
      %cst_15 = arith.constant dense<0.000000e+00> : vector<8x128xf32>
      %40 = vector.multi_reduction <add>, %39, %cst_15 [0] : vector<1x8x128xf32> to vector<8x128xf32>
      %41 = arith.addf %36, %40 : vector<8x128xf32>
      %c0_16 = arith.constant 0 : index
      %c0_17 = arith.constant 0 : index
      %42 = vector.load %arg7[%c0_16, %c0_17] : memref<8x128xf32, #tpu.memory_space<vmem>>, vector<8x128xf32>
      tpu.vector_store %arg7[%c0_16, %c0_17], %41 {strides = array<i32>} : memref<8x128xf32, #tpu.memory_space<vmem>>, vector<8x128xf32>,
    } else {
    }
    %c0_i32_6 = arith.constant 0 : i32
    %13 = arith.cmpi eq, %arg0, %c0_i32_6 : i32
    %14 = arith.extui %13 : i1 to i32
    %c0_i32_7 = arith.constant 0 : i32
    %15 = arith.cmpi ne, %14, %c0_i32_7 : i32
    scf.if %15 {
      %c0_8 = arith.constant 0 : index
      %c0_9 = arith.constant 0 : index
      %16 = vector.load %arg7[%c0_8, %c0_9] : memref<8x128xf32, #tpu.memory_space<vmem>>, vector<8x128xf32>
      %17 = vector.shape_cast %16 : vector<8x128xf32> to vector<1x8x128xf32>
      %cst = arith.constant dense<0.000000e+00> : vector<1xf32>
      %18 = vector.multi_reduction <add>, %17, %cst [1, 2] : vector<1x8x128xf32> to vector<1xf32>
      %19 = vector.shape_cast %18 : vector<1xf32> to vector<1x1x1xf32>
      %20 = vector.extract %19[0, 0, 0] : f32 from vector<1x1x1xf32>
      %21 = vector.broadcast %20 : f32 to vector<1x1xf32>
      %cst_10 = arith.constant 0.000000e+00 : f32
      %22 = vector.broadcast %cst_10 : f32 to vector<1x1xf32>
      %23 = arith.subf %22, %21 : vector<1x1xf32>
      %c0_11 = arith.constant 0 : index
      %c0_12 = arith.constant 0 : index
      %24 = vector.load %arg6[%c0_11, %c0_12] : memref<1x1xf32, #tpu.memory_space<vmem>>, vector<1x1xf32>
      tpu.vector_store %arg6[%c0_11, %c0_12], %23 {strides = array<i32>} : memref<1x1xf32, #tpu.memory_space<vmem>>, vector<1x1xf32>,
    } else {
    }
    return
  }
  func.func @transform_0(%arg0: i32) -> i32 {
    %c0_i32 = arith.constant 0 : i32
    %c0_i32_0 = arith.constant 0 : i32
    return %c0_i32 : i32
  }
  func.func @transform_1(%arg0: i32) -> i32 {
    %c0_i32 = arith.constant 0 : i32
    %c0_i32_0 = arith.constant 0 : i32
    return %c0_i32 : i32
  }
  func.func @transform_2(%arg0: i32) -> i32 {
    %c0_i32 = arith.constant 0 : i32
    %c0_i32_0 = arith.constant 0 : i32
    return %c0_i32 : i32
  }
  func.func @transform_3(%arg0: i32) -> (i32, i32) {
    %c0_i32 = arith.constant 0 : i32
    %c0_i32_0 = arith.constant 0 : i32
    return %arg0, %c0_i32 : i32, i32
  }
  func.func @transform_4(%arg0: i32) -> (i32, i32) {
    %c0_i32 = arith.constant 0 : i32
    %c0_i32_0 = arith.constant 0 : i32
    return %arg0, %c0_i32 : i32, i32
  }
  func.func @transform_5(%arg0: i32) -> (i32, i32) {
    %c0_i32 = arith.constant 0 : i32
    %c0_i32_0 = arith.constant 0 : i32
    %c0_i32_1 = arith.constant 0 : i32
    return %c0_i32, %c0_i32_0 : i32, i32
  }
}

</mosaic_0001>

<bundles_post_ra>
// kernel: tpu_custom_call.1
= control target key start
LH: loop header
LB: loop body
LE: loop exit
PB: predicated region body
PF: predicated region fallthrough
CT: control target
= control target key end

     0   :  { %12 = vsyncpa [#allocation8], 0  ;;  %s269_s0 = inlined_call_operand.<no memory space> [shape: s32[1], index: 0, kind: input, shape index: {}]   ;;  %s270_s1 = inlined_call_operand.vmem [shape: f32[64], index: 1, kind: input, shape index: {}]   ;;  %s271_s2 = inlined_call_operand.<no memory space> [shape: f32[1], index: 2, kind: input, shape index: {}]   ;;  %s272_s3 = inlined_call_operand.vmem [shape: f32[8,128], index: 3, kind: input, shape index: {}]   ;;  %s273_s4 = inlined_call_operand.hbm [shape: f32[8,128], index: 4, kind: input, shape index: {}]   ;;  %s274_s5 = inlined_call_operand.hbm [shape: f32[1,1], index: 5, kind: output, shape index: {}]  }
   0x1   :  { %13 = vsyncpa [#allocation6], 0 }
   0x2   :  { %14 = vsyncpa [#allocation7], 0  ;;  %s23_s20 = sshll.u32 %s270_s1, 4  ;;  %s24_s20 = int_to_ptr.vmem [resolvable:$true] %s23_s20 }
   0x3   :  { %s138_s21 = scalar_lea.vmem %s24_s20, 16  ;;  %p143_p1 = scmp.lt.s32.totalorder %s24_s20, %s24_s20 }
   0x4   :  { %p139_p0 = scmp.ne.s32.totalorder %s24_s20, %s138_s21  ;;  %p144_p2 = scmp.lt.s32.totalorder %s138_s21, %s138_s21 }
   0x6   :  { %p145_p3 = por %p144_p2, %p143_p1 }
   0x8   :  { %p146_p4 = pnand %p145_p3, %p139_p0 }
   0xa   :  { %149 = shalt.err (!%p146_p4)
}
   0xb   :  { %s200_s22 = smov [#allocation5]   ;;  %s201_s23 = smov [#allocation9]  }
   0xc   :  { %26 = dma.vmem_to_smem %s24_s20, 16, %s200_s22, [#allocation8]  }
   0xd   :  { %s37_s24 = sshll.u32 %s201_s23, 4  ;;  %s150_s27 = scalar_lea.hbm %s273_s4, 128  ;;  %s38_s24 = int_to_ptr.vmem [resolvable:$true] %s37_s24 }
   0xe   :  { %p151_p5 = scmp.ne.s32.totalorder %s273_s4, %s150_s27  ;;  %p154_p6 = scmp.lt.u32.totalorder %s150_s27, %s273_s4 }
  0x10   :  { %p156_p7 = pnand %p154_p6, %p151_p5 }
  0x12   :  { %159 = shalt.err (!%p156_p7)
}
  0x13   :  { %s160_s6 = scalar_lea.vmem %s38_s24, 128  ;;  %p165_p9 = scmp.lt.s32.totalorder %s38_s24, %s38_s24 }
  0x14   :  { %p161_p8 = scmp.ne.s32.totalorder %s38_s24, %s160_s6  ;;  %p166_p10 = scmp.lt.s32.totalorder %s160_s6, %s160_s6 }
  0x16   :  { %p167_p11 = por %p166_p10, %p165_p9 }
  0x18   :  { %p168_p12 = pnand %p167_p11, %p161_p8 }
  0x1a   :  { %171 = shalt.err (!%p168_p12)
}
  0x1b   :  { %40 = dma.hbm_to_vmem [thread:$0]  %s273_s4, 128, %s38_s24, [#allocation6]  }
  0x1c   :  { %194 = dma.done.wait [#allocation8], 16  }
  0x1d   :  { %195 = vsyncadd [#allocation8], 4294967280 }
  0x1e   :  { %196 = dma.done.wait [#allocation6], 128  }
  0x1f   :  { %197 = vsyncadd [#allocation6], 4294967168 }
  0x20   :  { %47 = sfence }
  0x21   :  { %s55_s11 = sld [smem:[#allocation5 + %s269_s0]]  ;;  %v76_v0 = vlaneseq  ;;  %v86_v4 = vld [vmem:[#allocation9] sm:$0xff]  ;;  %v89_v7 = vstv %s271_s2  ;;  %s202_s0 = smov [#allocation10]   ;;  %vm113_vm1 = vcmask 0  }
  0x22   :  { %v92_v11 = vld [vmem:[%s272_s3] sm:$0xff]  ;;  %s121_s2 = sshll.u32 %s202_s0, 4  ;;  %s122_s2 = int_to_ptr.vmem [resolvable:$true] %s121_s2 }
  0x23   :  { %v77_v1 = vshrl.u32 %v76_v0, 7  ;;  %v79_v2 = vand.u32 127, %v76_v0  ;;  %s172_s3 = scalar_lea.vmem %s122_s2, 16  ;;  %s176_s16 = scalar_lea.vmem %s122_s2, 32 }
  0x24   :  { %p173_p13 = scmp.ne.s32.totalorder %s122_s2, %s172_s3  ;;  %p177_p0 = scmp.lt.s32.totalorder %s122_s2, %s122_s2 }
  0x25   :  { %v83_v3 = vmul.u32 128, %v77_v1  ;;  %p178_p1 = scmp.lt.s32.totalorder %s176_s16, %s172_s3 }
  0x27   :  { %v84_v5 = vadd.s32 %v83_v3, %v79_v2  ;;  %v87_v6 = vstv %s55_s11  ;;  %p179_p2 = por %p178_p1, %p177_p0 }
  0x28   :  { %v88_v8 = vmul.f32 %v87_v6, %v86_v4 }
  0x29   :  { %vm85_vm0 = vcmp.lt.s32.totalorder %v84_v5, 16  ;;  %p180_p3 = pnand %p179_p2, %p173_p13 }
  0x2a   :  { %v90_v9 = vsub.f32 %v89_v7, %v88_v8  ;;  %v93_v13 = vsel %vm85_vm0, %v92_v11, 0.0 }
  0x2c   :  { %v91_v10 = vsel %vm85_vm0, %v90_v9, 1.0 }
  0x2d   :  { %136 = vlog2.f32 %v91_v10 }
  0x37   :  { %v137_v12 = vpop.eup %136 }
  0x38   :  { %v96_v14 = vmul.f32 0.6931472, %v137_v12 }
  0x3a   :  { %v97_v15 = vmul.f32 %v96_v14, %v93_v13 }
  0x3c   :  { %102 = vadd.xlane.f32.xlu0 %v97_v15 }
  0xc9   :  { %v103_v16 = vpop.xlane.xlu0 %102 }
  0xca   :  { %v104_v17 = vrot.slane %v103_v16, 4 }
  0xcc   :  { %v105_v18 = vadd.f32 %v104_v17, %v103_v16 }
  0xce   :  { %v106_v19 = vrot.slane %v105_v18, 2 }
  0xd0   :  { %v107_v20 = vadd.f32 %v106_v19, %v105_v18 }
  0xd2   :  { %v108_v21 = vrot.slane %v107_v20, 1 }
  0xd4   :  { %v109_v22 = vadd.f32 %v108_v21, %v107_v20 }
  0xd6   :  { %131 = vpush %v109_v22 }
 0x107   :  { %s132_s15 = spop %131 }
 0x108   :  { %v111_v23 = vstv %s132_s15 }
 0x109   :  { %v112_v24 = vsub.f32 0.0, %v111_v23 }
 0x10b   :  { %114 = vst.msk [vmem:[#allocation10] sm:$0x1] %vm113_vm1, %v112_v24 }
 0x10c   :  { %183 = shalt.err (!%p180_p3)
}
 0x10d   :  { %s184_s19 = scalar_lea.hbm %s274_s5, 16 }
 0x10e   :  { %p185_p4 = scmp.ne.s32.totalorder %s274_s5, %s184_s19  ;;  %p188_p5 = scmp.lt.u32.totalorder %s184_s19, %s274_s5 }
 0x110   :  { %p190_p6 = pnand %p188_p5, %p185_p4 }
 0x112   :  { %193 = shalt.err (!%p190_p6)
}
 0x113   :  { %124 = dma.vmem_to_hbm [thread:$0]  %s122_s2, 16, %s274_s5, [#allocation7]  }
 0x114   :  { %198 = dma.done.wait [#allocation7], 16  }
 0x115   :  { %199 = vsyncadd [#allocation7], 4294967280 }
 0x116   :  { %128 = vsyncpa [#allocation6], 1 }
 0x117   :  { %129 = vsyncpa [#allocation7], 1 }
 0x118   :  { %130 = vsyncpa [#allocation8], 1 }

</bundles_post_ra>
